<compile_context>
chip_gen: v5e
topology: v5e:2x2
jax: 0.10.0
libtpu: 0.0.40
codegen_flags: <defaults>
</compile_context>

<pallas_src>
import functools

import jax
import jax.numpy as jnp
import numpy as np
from jax import lax
from jax.experimental import pallas as pl
from jax.experimental.pallas import tpu as pltpu


# --------------------------------------------------------------------------- kernels


def freqs_kernel(w_ref, inv_freq_ref, freqs_ref, *, interpolation_factor):
    """Grid = (batch, seq_tiles). One step writes one (1, TS, dim) freqs tile.

    w_ref        : (batch,)       f32, SMEM   (per-batch time weights)
    inv_freq_ref : (1, dim)       f32, VMEM   (inv_freq duplicated: cat([f, f], -1))
    freqs_ref    : (1, TS, dim)   f32, VMEM   (lane-dense when dim % 128 == 0)
    """
    b = pl.program_id(0)
    s = pl.program_id(1)
    _, ts, dim = freqs_ref.shape

    # Fold the per-batch weight and interpolation factor into the tiny (1, dim) row,
    # so the big (TS, dim) tile sees exactly one multiply.
    scale = w_ref[b] / interpolation_factor                       # scalar
    row = inv_freq_ref[...] * scale                               # (1, dim)

    # positions for this seq tile
    pos = (lax.broadcasted_iota(jnp.int32, (ts, dim), 0) + s * ts).astype(jnp.float32)

    freqs_ref[0] = pos * row                                      # (TS, dim)


def pe_mask_kernel(w_is_one_ref, pe_ref, pe_out_ref):
    """Grid = (batch, row_tiles). pe_bias[w == 1] = 0 as a functional copy.

    w_is_one_ref : (batch,)        i32, SMEM (scalar prefetch)
    pe_ref       : (1, TS, pe_n)   VMEM   (block index forced to (0,0,0) on masked rows)
    pe_out_ref   : (1, TS, pe_n)   VMEM
    """
    b = pl.program_id(0)
    masked = w_is_one_ref[b] == 1

    @pl.when(masked)
    def _():
        pe_out_ref[...] = jnp.zeros_like(pe_out_ref)

    @pl.when(jnp.logical_not(masked))
    def _():
        pe_out_ref[...] = pe_ref[...]


# --------------------------------------------------------------------------- helpers


def _pick_seq_tile(n_rows, bytes_per_row, target_rows=512, tile_budget_bytes=4 << 20):
    """Largest row tile that (a) divides n_rows, (b) is a multiple of 8 (sublane rule),
    (c) keeps one tile under the budget; falls back to the full extent (which is always
    layout-legal since a block equal to the array dim is exempt from the (8,128) rule)."""
    cap = min(target_rows, max(8, tile_budget_bytes // max(int(bytes_per_row), 1)))
    cap = min(cap, n_rows)
    cap = (cap // 8) * 8
    for ts in range(cap, 7, -8):
        if n_rows % ts == 0:
            return ts
    return n_rows


def _compiler_params(pipeline_bytes, semantics):
    """Only raise the scoped-VMEM limit when the double-buffered footprint needs it
    (defaults: 16 MiB v5e / 32 MiB v6e, v7x)."""
    kwargs = dict(dimension_semantics=semantics)
    if pipeline_bytes > (12 << 20):
        kwargs["vmem_limit_bytes"] = int(min(pipeline_bytes + (4 << 20), 100 << 20))
    return pltpu.CompilerParams(**kwargs)


# --------------------------------------------------------------------------- wrapper


def bpe_rotary_forward(w, inv_freq_cat, pe_bias, seq_len, *, interpolation_factor=1.0):
    batch = w.shape[0]
    dim = inv_freq_cat.shape[-1]
    w = w.astype(jnp.float32)

    # ---------------- kernel 1: freqs = w[b] * outer(arange/interp, cat(inv_freq, inv_freq))
    ts_f = _pick_seq_tile(seq_len, dim * 4)
    freqs_pipeline_bytes = 2 * (ts_f * dim * 4) + 2 * (dim * 4)   # double-buffered out + row
    kernel = functools.partial(freqs_kernel,
                               interpolation_factor=float(interpolation_factor))
    freqs = pl.pallas_call(
        kernel,
        out_shape=jax.ShapeDtypeStruct((batch, seq_len, dim), jnp.float32),
        grid_spec=pltpu.PrefetchScalarGridSpec(
            num_scalar_prefetch=0,
            grid=(batch, seq_len // ts_f),
            in_specs=[
                # tiny per-batch scalar vector -> SMEM (no blocking, no per-step DMA)
                pl.BlockSpec(memory_space=pltpu.MemorySpace.SMEM),
                # duplicated inv_freq row: constant block index -> not re-fetched per step
                pl.BlockSpec((1, dim), lambda b, s: (0, 0)),
            ],
            out_specs=pl.BlockSpec((1, ts_f, dim), lambda b, s: (b, s, 0)),
        ),
        compiler_params=_compiler_params(freqs_pipeline_bytes, ("parallel", "parallel")),
    )(w, inv_freq_cat)

    # ---------------- kernel 2: pe_bias[w == 1] = 0   (separate call, own tiling)
    pe_out = None
    if pe_bias is not None:
        pe_rows, pe_n = pe_bias.shape[1], pe_bias.shape[2]
        itemsize = jnp.dtype(pe_bias.dtype).itemsize
        ts_p = _pick_seq_tile(pe_rows, pe_n * itemsize)
        pe_pipeline_bytes = 4 * (ts_p * pe_n * itemsize)          # 2 buffers x (in + out)

        # Compare in f32 (w's dtype), not pe.dtype, mirroring torch's `w.squeeze() == 1`.
        w_is_one = (w == 1.0).astype(jnp.int32)

        def pe_in_map(b, s, w1):
            # Masked rows: point the input DMA at a constant block so its HBM read is
            # not repeated for tiles whose contents are discarded (kernel writes zeros).
            keep = w1[b] == 0
            return (jnp.where(keep, b, 0), jnp.where(keep, s, 0), 0)

        pe_out = pl.pallas_call(
            pe_mask_kernel,
            out_shape=jax.ShapeDtypeStruct(pe_bias.shape, pe_bias.dtype),
            grid_spec=pltpu.PrefetchScalarGridSpec(
                num_scalar_prefetch=1,
                grid=(batch, pe_rows // ts_p),
                in_specs=[pl.BlockSpec((1, ts_p, pe_n), pe_in_map)],
                out_specs=pl.BlockSpec((1, ts_p, pe_n), lambda b, s, w1: (b, s, 0)),
            ),
            compiler_params=_compiler_params(pe_pipeline_bytes, ("parallel", "parallel")),
        )(w_is_one, pe_bias)

    # Module returns (freqs, 1.0); pe_bias is mutated in place in torch, returned here.
    return (freqs, 1.0), pe_out


# --------------------------------------------------------------------------- reference


def reference_forward(w, inv_freq_half, pe_bias, seq_len, *, interpolation_factor=1.0):
    # Pure-JAX reference mirroring the PyTorch forward.
    t = jnp.arange(seq_len, dtype=jnp.float32) / interpolation_factor
    freqs = jnp.einsum('i,j->ij', t, inv_freq_half)
    freqs = jnp.concatenate([freqs, freqs], axis=-1)[None]            # (1, seq, dim)
    freqs = w[:, None, None] * freqs                                   # (b, seq, dim)
    pe_out = jnp.where((w == 1.0)[:, None, None],
                       jnp.zeros_like(pe_bias), pe_bias)
    return freqs, pe_out


if __name__ == "__main__":
    # Small, module-consistent shapes.
    batch, seq_len, rot_dim = 2, 8, 128          # rot_dim multiple of 128 -> lane-dense freqs
    interpolation_factor = 1.0
    base, base_rescale_factor = 10000.0, 1.0

    # RotaryEmbedding.__init__ buffers (host-side, exactly as in the module).
    base = base * base_rescale_factor ** (rot_dim / (rot_dim - 2))
    inv_freq_half = (1.0 / base ** (np.arange(0, rot_dim, 2, dtype=np.float32) / rot_dim)
                     ).astype(np.float32)                                        # (dim/2,)
    inv_freq_cat = jnp.asarray(
        np.concatenate([inv_freq_half, inv_freq_half])[None, :], dtype=jnp.float32)  # (1, dim)

    key = jax.random.PRNGKey(0)
    pe_bias = jax.random.normal(key, (batch, seq_len, seq_len), dtype=jnp.float32)
    # schedule.get_time_weights output; 0/1 per the multitext assertion in the module.
    w = jnp.asarray([1.0, 0.0], dtype=jnp.float32)

    (freqs, scale), pe_out = bpe_rotary_forward(
        w, inv_freq_cat, pe_bias, seq_len, interpolation_factor=interpolation_factor)
    freqs = jax.block_until_ready(freqs)
    pe_out = jax.block_until_ready(pe_out)

    ref_freqs, ref_pe = reference_forward(
        w, jnp.asarray(inv_freq_half), pe_bias, seq_len,
        interpolation_factor=interpolation_factor)

    np.testing.assert_allclose(np.asarray(freqs), np.asarray(ref_freqs),
                               rtol=1e-6, atol=1e-6)
    np.testing.assert_allclose(np.asarray(pe_out), np.asarray(ref_pe),
                               rtol=1e-6, atol=1e-6)
    assert scale == 1.0

    print("KERNEL_OK")
</pallas_src>

<mosaic_0001>
module attributes {stable_mosaic.version = 11 : i64} {
  func.func @freqs_kernel(%arg0: i32, %arg1: i32, %arg2: memref<2xf32, #tpu.memory_space<smem>>, %arg3: memref<1x128xf32, #tpu.memory_space<vmem>>, %arg4: memref<1x8x128xf32, #tpu.memory_space<vmem>>) attributes {dimension_semantics = [#tpu.dimension_semantics<parallel>, #tpu.dimension_semantics<parallel>], iteration_bounds = array<i64: 2, 1>, scalar_prefetch = 0 : i64, scratch_operands = 0 : i64, tpu.core_type = #tpu.core_type<tc>, window_params = [{transform_indices = @transform_0, window_bounds = array<i64: 2>}, {pipeline_mode = #tpu.pipeline_mode<synchronous>, transform_indices = @transform_1, window_bounds = array<i64: 1, 128>}, {transform_indices = @transform_2, window_bounds = array<i64: 1, 8, 128>}]} {
    %0 = arith.index_cast %arg0 : i32 to index
    %1 = memref.load %arg2[%0] : memref<2xf32, #tpu.memory_space<smem>>
    %cst = arith.constant 1.000000e+00 : f32
    %2 = arith.divf %1, %cst : f32
    %c0 = arith.constant 0 : index
    %c0_0 = arith.constant 0 : index
    %3 = vector.load %arg3[%c0, %c0_0] : memref<1x128xf32, #tpu.memory_space<vmem>>, vector<1x128xf32>
    %4 = vector.broadcast %2 : f32 to vector<1x128xf32>
    %5 = arith.mulf %3, %4 : vector<1x128xf32>
    %6 = tpu.iota {dimensions = array<i32: 0>} : vector<8x128xi32>
    %c8_i32 = arith.constant 8 : i32
    %7 = arith.muli %arg1, %c8_i32 : i32
    %8 = vector.broadcast %7 : i32 to vector<8x128xi32>
    %9 = arith.addi %6, %8 : vector<8x128xi32>
    %10 = arith.sitofp %9 : vector<8x128xi32> to vector<8x128xf32>
    %11 = vector.broadcast %5 : vector<1x128xf32> to vector<8x128xf32>
    %12 = arith.mulf %10, %11 : vector<8x128xf32>
    %c0_1 = arith.constant 0 : index
    %c0_2 = arith.constant 0 : index
    %c0_3 = arith.constant 0 : index
    %13 = vector.load %arg4[%c0_1, %c0_2, %c0_3] : memref<1x8x128xf32, #tpu.memory_space<vmem>>, vector<1x8x128xf32>
    %14 = vector.shape_cast %13 : vector<1x8x128xf32> to vector<8x128xf32>
    %15 = vector.shape_cast %12 : vector<8x128xf32> to vector<1x8x128xf32>
    tpu.vector_store %arg4[%c0_1, %c0_2, %c0_3], %15 {strides = array<i32>} : memref<1x8x128xf32, #tpu.memory_space<vmem>>, vector<1x8x128xf32>,
    return
  }
  func.func @transform_0(%arg0: i32, %arg1: i32) -> i32 {
    %c0_i32 = arith.constant 0 : i32
    %c0_i32_0 = arith.constant 0 : i32
    return %c0_i32 : i32
  }
  func.func @transform_1(%arg0: i32, %arg1: i32) -> (i32, i32) {
    %c0_i32 = arith.constant 0 : i32
    %c0_i32_0 = arith.constant 0 : i32
    %c0_i32_1 = arith.constant 0 : i32
    return %c0_i32, %c0_i32_0 : i32, i32
  }
  func.func @transform_2(%arg0: i32, %arg1: i32) -> (i32, i32, i32) {
    %c0_i32 = arith.constant 0 : i32
    %c0_i32_0 = arith.constant 0 : i32
    return %arg0, %arg1, %c0_i32 : i32, i32, i32
  }
}

</mosaic_0001>

<bundles_post_ra>
// kernel: tpu_custom_call.1
= control target key start
LH: loop header
LB: loop body
LE: loop exit
PB: predicated region body
PF: predicated region fallthrough
CT: control target
= control target key end

     0   :  { %7 = vsyncpa [#allocation5], 0  ;;  %s637_s0 = inlined_call_operand.hbm [shape: f32[2], index: 0, kind: input, shape index: {}]   ;;  %s638_s1 = inlined_call_operand.hbm [shape: f32[1,128], index: 1, kind: input, shape index: {}]   ;;  %s639_s2 = inlined_call_operand.hbm [shape: f32[2,8,128], index: 2, kind: output, shape index: {}]  }
   0x1   :  { %8 = vsyncpa [#allocation3], 0 }
   0x2   :  { %9 = vsyncpa [#allocation4], 0 }
   0x3   :  { %11 = vsyncpa [#allocation4 + $0x1], 0  ;;  %s516_s9 = smov 0   ;;  %s518_s10 = smov 0  }
   0x4   :  { %s520_s11 = smov 0   ;;  %s522_s12 = smov 0  }
   0x5   :  { %s524_s13 = smov 0   ;;  %s526_s14 = smov 0  }
   0x6 LB: > { %s277_s15 = sadd.s32 4294967295, %s497_s14   ;;  %s278_s16 = sadd.s32 4294967294, %s497_s14   ;;  %s497_s14 = sphi %s526_s14, %s17_s14   ;;  %s493_s13 = sphi %s524_s13, %s648_s13   ;;  %s489_s12 = sphi %s522_s12, %s647_s12   ;;  %s485_s11 = sphi %s520_s11, %s646_s11   ;;  %s481_s10 = sphi %s518_s10, %s645_s10   ;;  %s477_s9 = sphi %s516_s9, %s644_s9  }
   0x7   : > { %s29_s17 = sadd.s32 1, %s493_s13  ;;  %s80_s18 = sadd.s32 1, %s485_s11 }
   0x8   : > { %p31_p0 = scmp.ge.s32.totalorder %s29_s17, 2  ;;  %p90_p1 = scmp.ne.s32.totalorder %s485_s11, %s481_s10 }
   0x9   : > { %p91_p2 = scmp.eq.s32.totalorder %s277_s15, 1  ;;  %p96_p3 = scmp.ne.s32.totalorder %s481_s10, %s477_s9 }
   0xa   : > { %s650_s17 = smov (%p31_p0, %s29_s17), 0  ;;  %p97_p5 = scmp.eq.s32.totalorder %s278_s16, 1 }
   0xb   : > { %p556_p4 = por %p91_p2, %p90_p1  ;;  %s75_s20 = ssub.s32 %s493_s13, %s650_s17 }
   0xc   : > { %p279_p6 = scmp.ge.s32.totalorder %s497_s14, 1  ;;  %p78_p7 = scmp.eq.s32.totalorder %s75_s20, 0 }
   0xd   : > { %p563_p8 = por %p97_p5, %p96_p3  ;;  %p104_p9 = scmp.lt.s32.totalorder %s497_s14, 3 }
   0xe   : > { %s569_s22 = scalar_select %p78_p7, %s485_s11, %s80_s18  }
   0xf   : > { %p571_p10 = pnand %p279_p6, %p104_p9  ;;  %p575_p11 = scmp.eq.s32.totalorder %s277_s15, 0 }
  0x10   : > { %s116_s27 = sshll.u32 %s637_s0, 4  ;;  %s126_s30 = sshll.u32 %s638_s1, 4  ;;  %s117_s27 = int_to_ptr.hbm [resolvable:$true] %s116_s27  ;;  %s127_s30 = int_to_ptr.hbm [resolvable:$true] %s126_s30 }
  0x11   : > { %p300_p12 = pneg %p571_p10  ;;  %s499_s3 = smov [#allocation6]  }
  0x12   : > { %s128_s4 = sshll.u32 %s499_s3, 4  ;;  %s500_s5 = smov [#allocation2]   ;;  %s129_s4 = int_to_ptr.vmem [resolvable:$true] %s128_s4 }
  0x13   : > { %p301_p13 = pnand %p575_p11, %p300_p12  ;;  %141 = sbr.rel (%p571_p10) target bundleno = 45 (0x2d), region = 28 }
  0x15   : > { %303 = dma.hbm_to_smem (!%p301_p13), %s117_s27, 16, %s500_s5, [#allocation5]  }
  0x16   : > { %306 = dma.hbm_to_vmem [thread:$0]  (!%p301_p13), %s127_s30, 16, %s129_s4, [#allocation3]  }
  0x18   : > { %464 = dma.done.wait (%p575_p11), [#allocation5], 16  }
  0x19   : > { %466 = vsyncadd (%p575_p11), [#allocation5], 4294967280 }
  0x1a   : > { %468 = dma.done.wait (%p575_p11), [#allocation3], 16  }
  0x1b   : > { %470 = vsyncadd (%p575_p11), [#allocation3], 4294967280 }
  0x1c   : > { %153 = sfence }
  0x1d   : > { %s162_s6 = sand.u32 1, %s481_s10   ;;  %s165_s7 = sld [smem:[#allocation2 + %s489_s12]]  ;;  %v169_v0 = vlaneseq  ;;  %v166_v2 = vld [vmem:[#allocation6] sm:$0x1] }
  0x1e   : > { %s285_s8 = sshll.u32 %s162_s6, 3  ;;  %s287_s15 = sshll.u32 %s489_s12, 3 }
  0x1f   : > { %v170_v1 = vshrl.u32 %v169_v0, 7  ;;  %s192_s20 = scalar_lea.hbm %s639_s2, %s287_s15  ;;  %s164_s23 = scalar_lea.vmem [#allocation7], %s285_s8 }
  0x20   : > { %s194_s24 = sshll.u32 %s164_s23, 4  ;;  %s196_s25 = sshll.u32 %s192_s20, 4  ;;  %s195_s24 = int_to_ptr.vmem [resolvable:$true] %s194_s24  ;;  %s197_s25 = int_to_ptr.hbm [resolvable:$true] %s196_s25 }
  0x21   : > { %v174_v5 = vcvt.s32.f32 %v170_v1  ;;  %s181_s26 = scalar_lea.sflag [#allocation4], %s162_s6  ;;  %s425_s12 = sshra.s32 %s197_s25, 4  ;;  %s426_s12 = int_to_ptr.hbm [resolvable:$true] %s425_s12 }
  0x22   : > { %s427_s27 = scalar_lea.hbm %s426_s12, 8  ;;  %s431_s30 = scalar_lea.hbm %s639_s2, 16 }
  0x23   : > { %v167_v3 = vstv %s165_s7  ;;  %p428_p0 = scmp.ne.s32.totalorder %s426_s12, %s427_s27  ;;  %p432_p3 = scmp.lt.s32.totalorder %s426_s12, %s639_s2 }
  0x24   : > { %v168_v4 = vmul.f32 %v167_v3, %v166_v2  ;;  %p433_p5 = scmp.lt.s32.totalorder %s431_s30, %s427_s27 }
  0x25   : > { %p429_p1 = pnand %p428_p0, %p556_p4 }
  0x26   : > { %v176_v6 = vperm.slane %v168_v4, 0  ;;  %p434_p6 = por %p433_p5, %p432_p3 }
  0x27   : > { %p430_p2 = pneg %p429_p1 }
  0x28   : > { %v178_v7 = vmul.f32 %v176_v6, %v174_v5 }
  0x29   : > { %p435_p7 = pnand %p434_p6, %p430_p2 }
  0x2a   : > { %179 = vst [vmem:[%s164_s23] sm:$0xff] %v178_v7 }
  0x2b   : > { %438 = shalt.err (!%p435_p7)
}
  0x2c   : > { %298 = dma.vmem_to_hbm [thread:$0]  (%p556_p4), %s195_s24, 128, %s197_s25, %s181_s26  }
  0x2d PF: > { %p315_p9 = scmp.ge.s32.totalorder %s497_s14, 2  ;;  %s208_s5 = sand.u32 1, %s477_s9  }
  0x2e   : > { %s209_s6 = scalar_lea.sflag [#allocation4], %s208_s5 }
  0x2f   : > { %p308_p10 = pnand %p315_p9, %p563_p8 }
  0x31   : > { %p309_p11 = pneg %p308_p10 }
  0x33   : > { %472 = dma.done.wait (%p309_p11), %s209_s6, 128  }
  0x34   : > { %474 = vsyncadd (%p309_p11), %s209_s6, 4294967168  ;;  %s17_s14 = sadd.s32 1, %s497_s14   ;;  %s644_s9 = smov %s481_s10 }
  0x35   : > { %p14_p12 = scmp.ge.s32.totalorder %s17_s14, 4   ;;  %s645_s10 = smov %s485_s11 }
  0x36   : > { %s646_s11 = smov %s569_s22  ;;  %s647_s12 = smov %s493_s13 }
  0x37   : > { %s648_s13 = smov %s650_s17  ;;  %16 = sbr.rel (!%p14_p12) target bundleno = 6 (0x6), region = 70 }
  0x3c   :  { %215 = vsyncpa [#allocation3], 1 }
  0x3d   :  { %217 = vsyncpa [#allocation3 + $0x1], 1 }
  0x3e   :  { %218 = vsyncpa [#allocation4], 1 }
  0x3f   :  { %220 = vsyncpa [#allocation4 + $0x1], 1 }
  0x40   :  { %221 = vsyncpa [#allocation5], 1 }
  0x41   :  { %223 = vsyncpa [#allocation5 + $0x1], 1 }

</bundles_post_ra>
